<compile_context>
chip_gen: v7x
topology: tpu7x:2x2x1
jax: 0.10.0
libtpu: 0.0.40
codegen_flags: <defaults>
</compile_context>

<pallas_src>
import jax
import jax.numpy as jnp
from jax.experimental import pallas as pl
from jax.experimental.pallas import tpu as pltpu


def _normalize_kernel(img_ref, mean_ref, inv_std_ref, out_ref):
    # img_ref/out_ref     : (bt, C*H*W)  lane-dense, sublane-dense data tile
    # mean_ref/inv_std_ref: (1,  C*H*W)  f32 per-channel params repeated over H*W
    x = img_ref[...].astype(jnp.float32)
    y = (x - mean_ref[...]) * inv_std_ref[...]          # VALU sub + mul, sublane broadcast
    out_ref[...] = y.astype(out_ref.dtype)


def _round_down_mult(x, m):
    return (x // m) * m


def multi_transform(img, mean, std, *, num_imgs_one_sp, block_batch=None,
                    out_dtype=None, target_resident_bytes=12 << 20,
                    min_blocks_for_megacore=8):
    """MultiTransform.forward with transform = per-channel normalize.

    `num_imgs_one_sp` is the module's chunk size; since the transform is elementwise
    per-sample, chunked application == whole-batch application, so the Pallas batch
    tile is sized independently from total VMEM residency (in + out, double-buffered).
    """
    assert num_imgs_one_sp >= 1
    B, C, H, W = img.shape
    CHW = C * H * W

    # Normalized output must be floating point even for uint8/int inputs
    # (opt-in bf16 via out_dtype= cuts store traffic when the consumer tolerates it).
    if out_dtype is None:
        out_dtype = img.dtype if jnp.issubdtype(img.dtype, jnp.floating) else jnp.float32
    out_dtype = jnp.dtype(out_dtype)

    in_it = jnp.dtype(img.dtype).itemsize
    out_it = out_dtype.itemsize

    # --- batch-tile sizing: VMEM-residency aware (in tile + out tile, x2 buffers) ---
    bytes_per_sample_resident = 2 * CHW * (in_it + out_it)
    if block_batch is not None:
        bt = min(int(block_batch), B)
    else:
        bt = min(max(1, target_resident_bytes // bytes_per_sample_resident), B)
        if B > 8:
            # keep >= min_blocks grid steps so v7x megacore can balance the grid;
            # measured-neutral on single-TC v5e/v6e.
            cap = ((max(1, B // min_blocks_for_megacore) + 7) // 8) * 8
            bt = min(bt, max(8, cap))
    if bt < B:
        # non-full blocks: second-to-last block dim must be a multiple of 8 (sublanes)
        bt = max(8, _round_down_mult(bt, 8)) if B >= 8 else B
    bt = min(bt, B)
    n_blocks = pl.cdiv(B, bt)          # ragged last block -> padded read / masked write

    # --- lane-dense 2D view and parameter prep (glue) ---
    img2d = img.reshape(B, CHW)
    mean_f = jnp.asarray(mean, jnp.float32).reshape(C)
    inv_std_f = 1.0 / jnp.asarray(std, jnp.float32).reshape(C)
    mean_row = jnp.repeat(mean_f, H * W).reshape(1, CHW)        # per-channel, repeated
    inv_std_row = jnp.repeat(inv_std_f, H * W).reshape(1, CHW)

    # --- compiler params: only raise the scoped-VMEM limit when residency needs it ---
    resident = bt * bytes_per_sample_resident + 4 * CHW * 4     # data bufs + param bufs
    cp_kwargs = dict(dimension_semantics=("parallel",))
    if resident > (14 << 20):                                   # v5e default scoped ~16 MiB
        cp_kwargs["vmem_limit_bytes"] = int(resident * 1.25) + (1 << 20)

    # In-place-style update (PyTorch mutates img) via aliasing when dtypes allow it.
    io_aliases = {0: 0} if out_dtype == img.dtype else {}

    out2d = pl.pallas_call(
        _normalize_kernel,
        out_shape=jax.ShapeDtypeStruct((B, CHW), out_dtype),
        grid_spec=pltpu.PrefetchScalarGridSpec(
            num_scalar_prefetch=0,
            grid=(n_blocks,),
            in_specs=[
                pl.BlockSpec((bt, CHW), lambda i: (i, 0)),      # streamed data tile
                pl.BlockSpec((1, CHW), lambda i: (0, 0)),       # resident params
                pl.BlockSpec((1, CHW), lambda i: (0, 0)),
            ],
            out_specs=pl.BlockSpec((bt, CHW), lambda i: (i, 0)),
        ),
        compiler_params=pltpu.CompilerParams(**cp_kwargs),
        input_output_aliases=io_aliases,
    )(img2d, mean_row, inv_std_row)

    return out2d.reshape(B, C, H, W)


if __name__ == "__main__":
    key = jax.random.PRNGKey(0)
    k1, k2 = jax.random.split(key)

    # Case 1: small canonical shapes, f32 input, batch divisible by the chunk size.
    B, C, H, W = 4, 4, 16, 16
    img = jax.random.uniform(k1, (B, C, H, W), dtype=jnp.float32)
    mean = jnp.linspace(0.2, 0.6, C, dtype=jnp.float32)
    std = jnp.linspace(0.5, 1.0, C, dtype=jnp.float32)

    out = multi_transform(img, mean, std, num_imgs_one_sp=2)
    jax.block_until_ready(out)

    ref = (img - mean.reshape(1, C, 1, 1)) / std.reshape(1, C, 1, 1)
    assert out.shape == img.shape and out.dtype == jnp.float32
    assert jnp.allclose(out, ref, atol=1e-5, rtol=1e-5), "mismatch vs reference (case 1)"

    # Case 2: uint8 input -> f32 output, batch NOT divisible by the batch tile
    # (exercises the ragged last block and the multi-block parallel grid).
    B2, C2 = 20, 3
    img2_i = jax.random.randint(k2, (B2, C2, H, W), 0, 256, dtype=jnp.int32)
    img2 = img2_i.astype(jnp.uint8)
    mean2 = jnp.array([125.3, 123.0, 113.9], dtype=jnp.float32)
    std2 = jnp.array([63.0, 62.1, 66.7], dtype=jnp.float32)

    out2 = multi_transform(img2, mean2, std2, num_imgs_one_sp=4, block_batch=8)
    jax.block_until_ready(out2)

    ref2 = (img2.astype(jnp.float32) - mean2.reshape(1, C2, 1, 1)) / std2.reshape(1, C2, 1, 1)
    assert out2.shape == img2.shape and out2.dtype == jnp.float32
    assert jnp.allclose(out2, ref2, atol=1e-4, rtol=1e-5), "mismatch vs reference (case 2)"

    # Case 3: opt-in bf16 output for uint8 input (reduced store traffic), auto tile size.
    out3 = multi_transform(img2, mean2, std2, num_imgs_one_sp=4, out_dtype=jnp.bfloat16)
    jax.block_until_ready(out3)
    assert out3.dtype == jnp.bfloat16
    assert jnp.allclose(out3.astype(jnp.float32), ref2, atol=5e-2), "mismatch (case 3, bf16)"

    print("KERNEL_OK")
</pallas_src>

<mosaic_0001>
module attributes {stable_mosaic.version = 11 : i64} {
  func.func @_normalize_kernel(%arg0: i32, %arg1: memref<4x1024xf32, #tpu.memory_space<vmem>>, %arg2: memref<1x1024xf32, #tpu.memory_space<vmem>>, %arg3: memref<1x1024xf32, #tpu.memory_space<vmem>>, %arg4: memref<4x1024xf32, #tpu.memory_space<vmem>>) attributes {dimension_semantics = [#tpu.dimension_semantics<parallel>], iteration_bounds = array<i64: 1>, scalar_prefetch = 0 : i64, scratch_operands = 0 : i64, tpu.core_type = #tpu.core_type<tc>, window_params = [{transform_indices = @transform_0, window_bounds = array<i64: 4, 1024>}, {pipeline_mode = #tpu.pipeline_mode<synchronous>, transform_indices = @transform_1, window_bounds = array<i64: 1, 1024>}, {pipeline_mode = #tpu.pipeline_mode<synchronous>, transform_indices = @transform_2, window_bounds = array<i64: 1, 1024>}, {transform_indices = @transform_3, window_bounds = array<i64: 4, 1024>}]} {
    %c0 = arith.constant 0 : index
    %c0_0 = arith.constant 0 : index
    %0 = vector.load %arg1[%c0, %c0_0] : memref<4x1024xf32, #tpu.memory_space<vmem>>, vector<4x1024xf32>
    %c0_1 = arith.constant 0 : index
    %c0_2 = arith.constant 0 : index
    %1 = vector.load %arg2[%c0_1, %c0_2] : memref<1x1024xf32, #tpu.memory_space<vmem>>, vector<1x1024xf32>
    %2 = vector.broadcast %1 : vector<1x1024xf32> to vector<4x1024xf32>
    %3 = arith.subf %0, %2 : vector<4x1024xf32>
    %c0_3 = arith.constant 0 : index
    %c0_4 = arith.constant 0 : index
    %4 = vector.load %arg3[%c0_3, %c0_4] : memref<1x1024xf32, #tpu.memory_space<vmem>>, vector<1x1024xf32>
    %5 = vector.broadcast %4 : vector<1x1024xf32> to vector<4x1024xf32>
    %6 = arith.mulf %3, %5 : vector<4x1024xf32>
    %c0_5 = arith.constant 0 : index
    %c0_6 = arith.constant 0 : index
    %7 = vector.load %arg4[%c0_5, %c0_6] : memref<4x1024xf32, #tpu.memory_space<vmem>>, vector<4x1024xf32>
    tpu.vector_store %arg4[%c0_5, %c0_6], %6 {strides = array<i32>} : memref<4x1024xf32, #tpu.memory_space<vmem>>, vector<4x1024xf32>,
    return
  }
  func.func @transform_0(%arg0: i32) -> (i32, i32) {
    %c0_i32 = arith.constant 0 : i32
    %c0_i32_0 = arith.constant 0 : i32
    return %arg0, %c0_i32 : i32, i32
  }
  func.func @transform_1(%arg0: i32) -> (i32, i32) {
    %c0_i32 = arith.constant 0 : i32
    %c0_i32_0 = arith.constant 0 : i32
    %c0_i32_1 = arith.constant 0 : i32
    return %c0_i32, %c0_i32_0 : i32, i32
  }
  func.func @transform_2(%arg0: i32) -> (i32, i32) {
    %c0_i32 = arith.constant 0 : i32
    %c0_i32_0 = arith.constant 0 : i32
    %c0_i32_1 = arith.constant 0 : i32
    return %c0_i32, %c0_i32_0 : i32, i32
  }
  func.func @transform_3(%arg0: i32) -> (i32, i32) {
    %c0_i32 = arith.constant 0 : i32
    %c0_i32_0 = arith.constant 0 : i32
    return %arg0, %c0_i32 : i32, i32
  }
}

</mosaic_0001>

<bundles_post_ra>
// kernel: tpu_custom_call.1
= control target key start
LH: loop header
LB: loop body
LE: loop exit
PB: predicated region body
PF: predicated region fallthrough
CT: control target
= control target key end

     0   :  { %8 = vsyncpa [#allocation3], 0  ;;  %s244_s0 = inlined_call_operand.hbm [shape: f32[4,1024], index: 0, kind: input, shape index: {}, may-alias: {0,3}]   ;;  %s245_s1 = inlined_call_operand.vmem [shape: f32[1,1024], index: 1, kind: input, shape index: {}]   ;;  %s246_s2 = inlined_call_operand.vmem [shape: f32[1,1024], index: 2, kind: input, shape index: {}]   ;;  %s247_s3 = inlined_call_operand.hbm [shape: f32[4,1024], index: 3, kind: output, shape index: {}, may-alias: {0,3}]  }
   0x1   :  { %9 = vsyncpa [#allocation4], 0  ;;  %s192_s12 = smov [#allocation2]   ;;  %s144_s16 = scalar_lea.hbm %s244_s0, 512 }
   0x2   :  { %s16_s13 = sshll.u32 %s192_s12, 4  ;;  %p145_p0 = scmp.ne.s32.totalorder %s244_s0, %s144_s16  ;;  %s17_s13 = int_to_ptr.vmem [resolvable:$true] %s16_s13 }
   0x3   :  { %p148_p1 = scmp.lt.u32.totalorder %s144_s16, %s244_s0 }
   0x5   :  { %p150_p2 = pnand %p148_p1, %p145_p0 }
   0x7   :  { %153 = shalt.err (!%p150_p2)
}
   0x8   :  { %s154_s21 = scalar_lea.vmem %s17_s13, 512  ;;  %p159_p4 = scmp.lt.s32.totalorder %s17_s13, %s17_s13 }
   0x9   :  { %p155_p3 = scmp.ne.s32.totalorder %s17_s13, %s154_s21  ;;  %p160_p5 = scmp.lt.s32.totalorder %s154_s21, %s154_s21 }
   0xb   :  { %p161_p6 = por %p160_p5, %p159_p4 }
   0xd   :  { %p162_p7 = pnand %p161_p6, %p155_p3 }
   0xf   :  { %165 = shalt.err (!%p162_p7)
}
  0x10   :  { %19 = dma.hbm_to_vmem [thread:$0]  %s244_s0, 512, %s17_s13, [#allocation3]  }
  0x11   :  { %188 = dma.done.wait [#allocation3], 512  }
  0x12   :  { %189 = vsyncadd [#allocation3], 4294966784  ;;  %v33_v0 = vlaneseq  ;;  %v31_v8 = vld [vmem:[%s245_s1] sm:$0xff]  ;;  %v28_v23 = vld [vmem:[#allocation2 + $0x8] sm:$0xff]  ;;  %s193_s0 = smov [#allocation5]  }
  0x13   :  { %v77_v9 = vld [vmem:[%s246_s2] sm:$0xff]  ;;  %v29_v28 = vld [vmem:[#allocation2 + $0x10] sm:$0xff]  ;;  %v30_v37 = vld [vmem:[#allocation2 + $0x18] sm:$0xff]  ;;  %s133_s1 = sshll.u32 %s193_s0, 4  ;;  %s134_s1 = int_to_ptr.vmem [resolvable:$true] %s133_s1 }
  0x14   :  { %v34_v1 = vshrl.u32 %v33_v0, 7  ;;  %v27_v16 = vld [vmem:[#allocation2] sm:$0xff]  ;;  %s166_s2 = scalar_lea.vmem %s134_s1, 512  ;;  %p171_p9 = scmp.lt.s32.totalorder %s134_s1, %s134_s1 }
  0x15   :  { %p167_p8 = scmp.ne.s32.totalorder %s134_s1, %s166_s2  ;;  %p172_p10 = scmp.lt.s32.totalorder %s166_s2, %s166_s2 }
  0x16   :  { %v35_v2 = vsub.s32 0, %v34_v1  ;;  %v39_v3 = vsub.s32 1, %v34_v1  ;;  %v43_v4 = vsub.s32 2, %v34_v1  ;;  %v47_v5 = vsub.s32 3, %v34_v1 }
  0x17   :  { %v51_v6 = vsub.s32 4, %v34_v1  ;;  %v55_v7 = vsub.s32 5, %v34_v1  ;;  %v59_v10 = vsub.s32 6, %v34_v1  ;;  %v63_v11 = vsub.s32 7, %v34_v1  ;;  %p173_p11 = por %p172_p10, %p171_p9 }
  0x18   :  { %v36_v12 = vrot.slane %v31_v8, %v35_v2  ;;  %v40_v13 = vrot.slane %v31_v8, %v39_v3  ;;  %v82_v14 = vrot.slane %v77_v9, %v35_v2  ;;  %v86_v15 = vrot.slane %v77_v9, %v39_v3 }
  0x19   :  { %v44_v17 = vrot.slane %v31_v8, %v43_v4  ;;  %v48_v18 = vrot.slane %v31_v8, %v47_v5  ;;  %v90_v19 = vrot.slane %v77_v9, %v43_v4  ;;  %v94_v20 = vrot.slane %v77_v9, %v47_v5  ;;  %p174_p12 = pnand %p173_p11, %p167_p8 }
  0x1a   :  { %v65_v21 = vcombine.low %v36_v12, %v40_v13  ;;  %v111_v22 = vcombine.low %v82_v14, %v86_v15  ;;  %v52_v24 = vrot.slane %v31_v8, %v51_v6  ;;  %v56_v25 = vrot.slane %v31_v8, %v55_v7 }
  0x1b   :  { %v66_v26 = vcombine.low %v44_v17, %v48_v18  ;;  %v112_v27 = vcombine.low %v90_v19, %v94_v20  ;;  %v98_v29 = vrot.slane %v77_v9, %v51_v6  ;;  %v102_v30 = vrot.slane %v77_v9, %v55_v7 }
  0x1c   :  { %v73_v31 = vsub.f32 %v27_v16, %v65_v21  ;;  %v67_v32 = vcombine.low %v52_v24, %v56_v25  ;;  %v60_v33 = vrot.slane %v31_v8, %v59_v10  ;;  %v64_v34 = vrot.slane %v31_v8, %v63_v11 }
  0x1d   :  { %v74_v35 = vsub.f32 %v28_v23, %v66_v26  ;;  %v113_v36 = vcombine.low %v98_v29, %v102_v30  ;;  %v106_v38 = vrot.slane %v77_v9, %v59_v10  ;;  %v110_v39 = vrot.slane %v77_v9, %v63_v11 }
  0x1e   :  { %v119_v40 = vmul.f32 %v111_v22, %v73_v31  ;;  %v75_v41 = vsub.f32 %v29_v28, %v67_v32  ;;  %v68_v42 = vcombine.low %v60_v33, %v64_v34 }
  0x1f   :  { %v120_v43 = vmul.f32 %v112_v27, %v74_v35  ;;  %v114_v44 = vcombine.low %v106_v38, %v110_v39 }
  0x20   :  { %123 = vst [vmem:[#allocation5] sm:$0xff] %v119_v40  ;;  %v121_v45 = vmul.f32 %v113_v36, %v75_v41  ;;  %v76_v46 = vsub.f32 %v30_v37, %v68_v42 }
  0x21   :  { %124 = vst [vmem:[#allocation5 + $0x8] sm:$0xff] %v120_v43 }
  0x22   :  { %125 = vst [vmem:[#allocation5 + $0x10] sm:$0xff] %v121_v45  ;;  %v122_v47 = vmul.f32 %v114_v44, %v76_v46 }
  0x24   :  { %126 = vst [vmem:[#allocation5 + $0x18] sm:$0xff] %v122_v47 }
  0x25   :  { %177 = shalt.err (!%p174_p12)
}
  0x26   :  { %s178_s30 = scalar_lea.hbm %s247_s3, 512 }
  0x27   :  { %p179_p13 = scmp.ne.s32.totalorder %s247_s3, %s178_s30  ;;  %p182_p0 = scmp.lt.u32.totalorder %s178_s30, %s247_s3 }
  0x29   :  { %p184_p1 = pnand %p182_p0, %p179_p13 }
  0x2b   :  { %187 = shalt.err (!%p184_p1)
}
  0x2c   :  { %136 = dma.vmem_to_hbm [thread:$0]  %s134_s1, 512, %s247_s3, [#allocation4]  }
  0x2d   :  { %190 = dma.done.wait [#allocation4], 512  }
  0x2e   :  { %191 = vsyncadd [#allocation4], 4294966784 }
  0x2f   :  { %140 = vsyncpa [#allocation3], 1 }
  0x30   :  { %141 = vsyncpa [#allocation4], 1 }

</bundles_post_ra>
